<compile_context>
chip_gen: v5e
topology: v5e:2x2
jax: 0.10.0
libtpu: 0.0.40
codegen_flags: <defaults>
</compile_context>

<pallas_src>
import functools

import jax
import jax.numpy as jnp
import numpy as np
from jax import lax
from jax.experimental import pallas as pl
from jax.experimental.pallas import tpu as pltpu

NEG_SLOPE = 0.1  # LeakyReLU(negative_slope=0.1) used throughout the module


def _leaky(v):
    return jnp.where(v > 0, v, NEG_SLOPE * v)


def block_kernel(a1_ref, w1_ref, w2_ref, out_ref, *, H, WC, WO,
                 use_projection, mm_dtype):
    """One batch sample per grid step; everything stays lane-dense.

    a1_ref  : (1, H, 3*WC)           three ky-shifted input row-slabs, WC=W*Cin
    w1_ref  : (3*WC, WO) or (3*WC, 2*WO)  banded conv1 weights
                                          (+WO fused projection columns)
    w2_ref  : (3*WO, WO)             banded conv2 weights, WO = W*oc
    out_ref : (1, H, WO)             lane-dense output slab
    """
    a1 = a1_ref[0]                                              # (H, 3*WC) f32

    # ---- conv1 (+ fused 1x1 projection): a single MXU matmul ----
    m = jnp.dot(a1.astype(mm_dtype), w1_ref[...],
                preferred_element_type=jnp.float32)
    if use_projection:
        y1 = _leaky(m[:, :WO])                                  # (H, WO)
        res = m[:, WO:]                                         # (H, WO)
    else:
        y1 = _leaky(m)                                          # (H, WO)
        res = a1[:, WC:2 * WC]            # identity residual (Cin == oc)

    # ---- conv2: +/-1 row shifts (zero fill) via sublane concats, one matmul
    zrow = jnp.zeros((1, WO), jnp.float32)
    up = jnp.concatenate([zrow, y1[:H - 1]], axis=0)            # row y-1
    dn = jnp.concatenate([y1[1:], zrow], axis=0)                # row y+1
    a2 = jnp.concatenate([up, y1, dn], axis=1)                  # (H, 3*WO)
    y2 = _leaky(jnp.dot(a2.astype(mm_dtype), w2_ref[...],
                        preferred_element_type=jnp.float32))

    # Lane-dense store (W*oc = 128 at the test shapes -> unmasked vst).
    out_ref[0] = _leaky(y2 + res)


def _banded(w_tap, width, offset):
    """(Cin, oc) tap -> (width*Cin, width*oc) block-banded matrix.

    Entry [x_in*Cin + c, x*oc + o] = w_tap[c, o] iff x == x_in + offset;
    out-of-range positions are dropped, which implements the zero padding.
    """
    eye = jnp.eye(width, width, k=offset, dtype=jnp.float32)
    return jnp.kron(eye, w_tap.astype(jnp.float32))


def atrous_resnet_block_forward(x, w1_hwio, w2_hwio, wp, dilation,
                                use_bf16_matmul=False):
    """x: (N, H, W, Cin) f32; w1/w2: HWIO 3x3; wp: (Cin, oc) -> (N, H, W, oc)."""
    N, H, W, Cin = x.shape
    oc = w1_hwio.shape[-1]
    d = int(dilation)
    use_projection = (Cin != oc)      # spatial dims always preserved (pad==dil)
    WC, WO = W * Cin, W * oc
    mm_dtype = jnp.bfloat16 if use_bf16_matmul else jnp.float32

    # --- input: pad vertically by d, flatten (W, Cin) onto the lane axis and
    # stack the three ky row-shifted slabs (wrapper-side vertical im2col). ---
    xp = jnp.pad(x, ((0, 0), (d, d), (0, 0), (0, 0))).reshape(N, H + 2 * d, WC)
    a1 = jnp.concatenate(
        [xp[:, 0:H], xp[:, d:d + H], xp[:, 2 * d:2 * d + H]],
        axis=-1)                                                # (N, H, 3*WC)

    # --- banded conv1 weights: row blocks ky = 0,1,2; horizontal taps and
    # horizontal zero padding folded into the band offsets (1 - kx)*d. ---
    w1_bands = jnp.concatenate(
        [sum(_banded(w1_hwio[ky, kx], W, (1 - kx) * d) for kx in range(3))
         for ky in range(3)], axis=0)                           # (3*WC, WO)
    if use_projection:
        # 1x1 projection fused as extra output columns fed by the ky=1 block.
        proj = jnp.concatenate(
            [jnp.zeros((WC, WO), jnp.float32),
             _banded(wp, W, 0),
             jnp.zeros((WC, WO), jnp.float32)], axis=0)         # (3*WC, WO)
        w1_bands = jnp.concatenate([w1_bands, proj], axis=1)    # (3*WC, 2*WO)

    # --- banded conv2 weights (kernel 3, dilation 1, padding 1). ---
    w2_bands = jnp.concatenate(
        [sum(_banded(w2_hwio[ky, kx], W, 1 - kx) for kx in range(3))
         for ky in range(3)], axis=0)                           # (3*WO, WO)

    w1_bands = w1_bands.astype(mm_dtype)
    w2_bands = w2_bands.astype(mm_dtype)

    kern = functools.partial(block_kernel, H=H, WC=WC, WO=WO,
                             use_projection=use_projection, mm_dtype=mm_dtype)

    out_flat = pl.pallas_call(
        kern,
        out_shape=jax.ShapeDtypeStruct((N, H, WO), jnp.float32),
        grid=(N,),
        in_specs=[
            pl.BlockSpec((1, H, 3 * WC), lambda n: (n, 0, 0)),
            pl.BlockSpec(w1_bands.shape, lambda n: (0, 0)),
            pl.BlockSpec(w2_bands.shape, lambda n: (0, 0)),
        ],
        out_specs=pl.BlockSpec((1, H, WO), lambda n: (n, 0, 0)),
        compiler_params=pltpu.CompilerParams(
            dimension_semantics=("parallel",)),
    )(a1, w1_bands, w2_bands)

    # (N, H, W*oc) -> (N, H, W, oc): contiguous, free reshape in the wrapper.
    return out_flat.reshape(N, H, W, oc)


def atrous_resnet_block_reference(x, w1_hwio, w2_hwio, wp, dilation):
    """Pure-JAX reference (NHWC), mirrors the PyTorch module semantics."""
    dn = ('NHWC', 'HWIO', 'NHWC')
    d = int(dilation)
    prec = lax.Precision.HIGHEST
    y1 = _leaky(lax.conv_general_dilated(
        x, w1_hwio, (1, 1), [(d, d), (d, d)],
        rhs_dilation=(d, d), dimension_numbers=dn, precision=prec))
    y2 = _leaky(lax.conv_general_dilated(
        y1, w2_hwio, (1, 1), [(1, 1), (1, 1)], dimension_numbers=dn,
        precision=prec))
    if x.shape[-1] != y2.shape[-1]:
        res = lax.conv_general_dilated(
            x, wp.reshape(1, 1, *wp.shape), (1, 1), 'VALID',
            dimension_numbers=dn, precision=prec)
    else:
        res = x
    return _leaky(y2 + res)


if __name__ == "__main__":
    key = jax.random.PRNGKey(0)
    configs = [
        # (N, Cin, H, W, out_channels, dilation)
        (2, 4, 16, 16, 8, 2),   # projection path (Cin != oc)
        (2, 8, 16, 16, 8, 3),   # identity-residual path (Cin == oc)
    ]
    for (N, Cin, H, W, oc, dil) in configs:
        key, kx_, k1, k2, kp = jax.random.split(key, 5)
        # deterministic synthetic parameters (module would use kaiming_uniform)
        x = jax.random.normal(kx_, (N, H, W, Cin), jnp.float32)
        w1 = jax.random.normal(k1, (3, 3, Cin, oc), jnp.float32) * 0.2
        w2 = jax.random.normal(k2, (3, 3, oc, oc), jnp.float32) * 0.2
        wp = jax.random.normal(kp, (Cin, oc), jnp.float32) * 0.5

        out = atrous_resnet_block_forward(x, w1, w2, wp, dil)
        out = jax.block_until_ready(out)
        assert out.shape == (N, H, W, oc)

        ref = atrous_resnet_block_reference(x, w1, w2, wp, dil)
        np.testing.assert_allclose(np.asarray(out), np.asarray(ref),
                                   rtol=2e-4, atol=2e-4)
    print("KERNEL_OK")
</pallas_src>

<mosaic_0001>
module attributes {stable_mosaic.version = 11 : i64} {
  func.func @block_kernel(%arg0: i32, %arg1: memref<1x16x192xf32, #tpu.memory_space<vmem>>, %arg2: memref<192x256xf32, #tpu.memory_space<vmem>>, %arg3: memref<384x128xf32, #tpu.memory_space<vmem>>, %arg4: memref<1x16x128xf32, #tpu.memory_space<vmem>>) attributes {dimension_semantics = [#tpu.dimension_semantics<parallel>], iteration_bounds = array<i64: 2>, scalar_prefetch = 0 : i64, scratch_operands = 0 : i64, tpu.core_type = #tpu.core_type<tc>, window_params = [{transform_indices = @transform_0, window_bounds = array<i64: 1, 16, 192>}, {pipeline_mode = #tpu.pipeline_mode<synchronous>, transform_indices = @transform_1, window_bounds = array<i64: 192, 256>}, {pipeline_mode = #tpu.pipeline_mode<synchronous>, transform_indices = @transform_2, window_bounds = array<i64: 384, 128>}, {transform_indices = @transform_3, window_bounds = array<i64: 1, 16, 128>}]} {
    %c0 = arith.constant 0 : index
    %c0_0 = arith.constant 0 : index
    %c0_1 = arith.constant 0 : index
    %0 = vector.load %arg1[%c0, %c0_0, %c0_1] : memref<1x16x192xf32, #tpu.memory_space<vmem>>, vector<1x16x192xf32>
    %1 = vector.shape_cast %0 : vector<1x16x192xf32> to vector<16x192xf32>
    %c0_2 = arith.constant 0 : index
    %c0_3 = arith.constant 0 : index
    %2 = vector.load %arg2[%c0_2, %c0_3] : memref<192x256xf32, #tpu.memory_space<vmem>>, vector<192x256xf32>
    %cst = arith.constant dense<0.000000e+00> : vector<16x256xf32>
    %3 = tpu.matmul %1, %2, %cst {dimension_numbers = #tpu.dot_dimension_numbers<[1], [0], [0], [1], [0, 0, 1, 1], [], []>} : vector<16x192xf32>, vector<192x256xf32>, vector<16x256xf32> -> vector<16x256xf32>
    %4 = vector.extract_strided_slice %3 {offsets = [0, 0], sizes = [16, 128], strides = [1, 1]} : vector<16x256xf32> to vector<16x128xf32>
    %cst_4 = arith.constant 0.000000e+00 : f32
    %5 = vector.broadcast %cst_4 : f32 to vector<16x128xf32>
    %6 = arith.cmpf ogt, %4, %5 : vector<16x128xf32>
    %cst_5 = arith.constant 1.000000e-01 : f32
    %7 = vector.broadcast %cst_5 : f32 to vector<16x128xf32>
    %8 = arith.mulf %7, %4 : vector<16x128xf32>
    %9 = arith.select %6, %4, %8 : vector<16x128xi1>, vector<16x128xf32>
    %10 = vector.extract_strided_slice %3 {offsets = [0, 128], sizes = [16, 128], strides = [1, 1]} : vector<16x256xf32> to vector<16x128xf32>
    %cst_6 = arith.constant 0.000000e+00 : f32
    %11 = vector.broadcast %cst_6 : f32 to vector<1x128xf32>
    %12 = vector.extract_strided_slice %9 {offsets = [0, 0], sizes = [15, 128], strides = [1, 1]} : vector<16x128xf32> to vector<15x128xf32>
    %13 = tpu.concatenate %11, %12 in 0 : vector<1x128xf32>, vector<15x128xf32> -> vector<16x128xf32>
    %14 = vector.extract_strided_slice %9 {offsets = [1, 0], sizes = [15, 128], strides = [1, 1]} : vector<16x128xf32> to vector<15x128xf32>
    %15 = tpu.concatenate %14, %11 in 0 : vector<15x128xf32>, vector<1x128xf32> -> vector<16x128xf32>
    %16 = tpu.concatenate %13, %9, %15 in 1 : vector<16x128xf32>, vector<16x128xf32>, vector<16x128xf32> -> vector<16x384xf32>
    %c0_7 = arith.constant 0 : index
    %c0_8 = arith.constant 0 : index
    %17 = vector.load %arg3[%c0_7, %c0_8] : memref<384x128xf32, #tpu.memory_space<vmem>>, vector<384x128xf32>
    %cst_9 = arith.constant dense<0.000000e+00> : vector<16x128xf32>
    %18 = tpu.matmul %16, %17, %cst_9 {dimension_numbers = #tpu.dot_dimension_numbers<[1], [0], [0], [1], [0, 0, 1, 1], [], []>} : vector<16x384xf32>, vector<384x128xf32>, vector<16x128xf32> -> vector<16x128xf32>
    %cst_10 = arith.constant 0.000000e+00 : f32
    %19 = vector.broadcast %cst_10 : f32 to vector<16x128xf32>
    %20 = arith.cmpf ogt, %18, %19 : vector<16x128xf32>
    %cst_11 = arith.constant 1.000000e-01 : f32
    %21 = vector.broadcast %cst_11 : f32 to vector<16x128xf32>
    %22 = arith.mulf %21, %18 : vector<16x128xf32>
    %23 = arith.select %20, %18, %22 : vector<16x128xi1>, vector<16x128xf32>
    %24 = arith.addf %23, %10 : vector<16x128xf32>
    %cst_12 = arith.constant 0.000000e+00 : f32
    %25 = vector.broadcast %cst_12 : f32 to vector<16x128xf32>
    %26 = arith.cmpf ogt, %24, %25 : vector<16x128xf32>
    %cst_13 = arith.constant 1.000000e-01 : f32
    %27 = vector.broadcast %cst_13 : f32 to vector<16x128xf32>
    %28 = arith.mulf %27, %24 : vector<16x128xf32>
    %29 = arith.select %26, %24, %28 : vector<16x128xi1>, vector<16x128xf32>
    %c0_14 = arith.constant 0 : index
    %c0_15 = arith.constant 0 : index
    %c0_16 = arith.constant 0 : index
    %30 = vector.load %arg4[%c0_14, %c0_15, %c0_16] : memref<1x16x128xf32, #tpu.memory_space<vmem>>, vector<1x16x128xf32>
    %31 = vector.shape_cast %30 : vector<1x16x128xf32> to vector<16x128xf32>
    %32 = vector.shape_cast %29 : vector<16x128xf32> to vector<1x16x128xf32>
    tpu.vector_store %arg4[%c0_14, %c0_15, %c0_16], %32 {strides = array<i32>} : memref<1x16x128xf32, #tpu.memory_space<vmem>>, vector<1x16x128xf32>,
    return
  }
  func.func @transform_0(%arg0: i32) -> (i32, i32, i32) {
    %c0_i32 = arith.constant 0 : i32
    %c0_i32_0 = arith.constant 0 : i32
    %c0_i32_1 = arith.constant 0 : i32
    return %arg0, %c0_i32, %c0_i32_0 : i32, i32, i32
  }
  func.func @transform_1(%arg0: i32) -> (i32, i32) {
    %c0_i32 = arith.constant 0 : i32
    %c0_i32_0 = arith.constant 0 : i32
    %c0_i32_1 = arith.constant 0 : i32
    return %c0_i32, %c0_i32_0 : i32, i32
  }
  func.func @transform_2(%arg0: i32) -> (i32, i32) {
    %c0_i32 = arith.constant 0 : i32
    %c0_i32_0 = arith.constant 0 : i32
    %c0_i32_1 = arith.constant 0 : i32
    return %c0_i32, %c0_i32_0 : i32, i32
  }
  func.func @transform_3(%arg0: i32) -> (i32, i32, i32) {
    %c0_i32 = arith.constant 0 : i32
    %c0_i32_0 = arith.constant 0 : i32
    %c0_i32_1 = arith.constant 0 : i32
    return %arg0, %c0_i32, %c0_i32_0 : i32, i32, i32
  }
}

</mosaic_0001>

<bundles_post_ra>
// kernel: tpu_custom_call.1
= control target key start
LH: loop header
LB: loop body
LE: loop exit
PB: predicated region body
PF: predicated region fallthrough
CT: control target
= control target key end

     0   :  { %8 = vsyncpa [#allocation3], 0  ;;  %s1112_s0 = inlined_call_operand.hbm [shape: f32[2,16,192], index: 0, kind: input, shape index: {}]   ;;  %s1113_s1 = inlined_call_operand.hbm [shape: f32[192,256], index: 1, kind: input, shape index: {}]   ;;  %s1114_s2 = inlined_call_operand.hbm [shape: f32[384,128], index: 2, kind: input, shape index: {}]   ;;  %s1115_s3 = inlined_call_operand.hbm [shape: f32[2,16,128], index: 3, kind: output, shape index: {}]  }
   0x1   :  { %10 = vsyncpa [#allocation3 + $0x1], 0 }
   0x2   :  { %11 = vsyncpa [#allocation6], 0 }
   0x3   :  { %12 = vsyncpa [#allocation4], 0 }
   0x4   :  { %14 = vsyncpa [#allocation4 + $0x1], 0  ;;  %s944_s12 = smov 0   ;;  %s946_s13 = smov 0  }
   0x5   :  { %s948_s14 = smov 0   ;;  %s950_s15 = smov 0  }
   0x6 LB: > { %s965_s16 = sadd.s32 4294967295, %s914_s15   ;;  %s638_s17 = sadd.s32 4294967294, %s914_s15   ;;  %s914_s15 = sphi %s950_s15, %s1125_s15   ;;  %s910_s14 = sphi %s948_s14, %s1124_s14   ;;  %s906_s13 = sphi %s946_s13, %s1123_s13   ;;  %s902_s12 = sphi %s944_s12, %s1122_s12  }
   0x7   : > { %p40_p0 = scmp.ne.s32.totalorder %s906_s13, %s902_s12  ;;  %p41_p1 = scmp.eq.s32.totalorder %s965_s16, 0 }
   0x8   : > { %p106_p2 = scmp.eq.s32.totalorder %s965_s16, 1  ;;  %p112_p3 = scmp.eq.s32.totalorder %s638_s17, 1 }
   0x9   : > { %p974_p4 = por %p41_p1, %p40_p0  ;;  %p639_p5 = scmp.ge.s32.totalorder %s914_s15, 1 }
   0xa   : > { %p979_p6 = por %p112_p3, %p40_p0  ;;  %p119_p7 = scmp.lt.s32.totalorder %s914_s15, 3 }
   0xb   : > { %s130_s22 = sshll.u32 %s1113_s1, 4  ;;  %s916_s24 = smov [#allocation5]   ;;  %s131_s22 = int_to_ptr.hbm [resolvable:$true] %s130_s22 }
   0xc   : > { %p987_p8 = pnand %p639_p5, %p119_p7  ;;  %s132_s25 = sshll.u32 %s916_s24, 4  ;;  %s133_s25 = int_to_ptr.vmem [resolvable:$true] %s132_s25 }
   0xd   : > { %s144_s28 = sshll.u32 %s1114_s2, 4  ;;  %s917_s29 = smov 256   ;;  %s145_s28 = int_to_ptr.hbm [resolvable:$true] %s144_s28 }
   0xe   : > { %p693_p9 = pneg %p987_p8  ;;  %s918_s30 = smov 16  }
   0xf   : > { %s919_s4 = smov [#allocation7]   ;;  %s920_s6 = smov 128  }
  0x10   : > { %p694_p10 = pnand %p693_p9, %p41_p1  ;;  %s146_s5 = sshll.u32 %s919_s4, 4  ;;  %s147_s5 = int_to_ptr.vmem [resolvable:$true] %s146_s5 }
  0x11   : > { %s921_s7 = smov 8   ;;  %s1003_s8 = sadd.s32 1, %s914_s15  }
  0x12   : > { %696 = dma.hbm_to_vmem [thread:$0]  (!%p694_p10), %s131_s22, 6144, %s133_s25, [#allocation6], %s917_s29, %s917_s29, %s918_s30  }
  0x13   : > { %699 = dma.hbm_to_vmem [thread:$0]  (!%p694_p10), %s145_s28, 6144, %s147_s5, [#allocation6], %s920_s6, %s920_s6, %s921_s7  }
  0x14   : > { %s24_s9 = ssub.s32 %s914_s15, %s1003_s8  ;;  %s27_s10 = sadd.s32 1, %s910_s14 }
  0x15   : > { %p25_p12 = scmp.eq.s32.totalorder %s24_s9, 0  ;;  %p34_p13 = scmp.ne.s32.totalorder %s910_s14, %s906_s13 }
  0x16   : > { %p35_p0 = scmp.eq.s32.totalorder %s914_s15, 0  ;;  %p710_p7 = scmp.lt.s32.totalorder %s914_s15, 2 }
  0x17   : > { %s1012_s11 = scalar_select %p25_p12, %s910_s14, %s27_s10  }
  0x18   : > { %p36_p3 = por %p35_p0, %p34_p13  ;;  %p1016_p5 = por %p106_p2, %p34_p13 }
  0x19   : > { %s160_s20 = sand.u32 1, %s910_s14   ;;  %s663_s22 = sshll.u32 %s914_s15, 5 }
  0x1a   : > { %s643_s21 = sshll.u32 %s160_s20, 5  ;;  %s169_s26 = scalar_lea.hbm %s1112_s0, %s663_s22 }
  0x1b   : > { %s164_s27 = scalar_lea.vmem [#allocation2], %s643_s21  ;;  %s170_s4 = sshll.u32 %s169_s26, 4  ;;  %s171_s4 = int_to_ptr.hbm [resolvable:$true] %s170_s4 }
  0x1c   : > { %s172_s28 = sshll.u32 %s164_s27, 4  ;;  %p1026_p9 = pnand %p710_p7, %p36_p3  ;;  %s173_s28 = int_to_ptr.vmem [resolvable:$true] %s172_s28 }
  0x1d   : > { %s161_s6 = scalar_lea.sflag [#allocation3], %s160_s20  ;;  %s814_s7 = sshra.s32 %s171_s4, 4  ;;  %s815_s7 = int_to_ptr.hbm [resolvable:$true] %s814_s7 }
  0x1e   : > { %s816_s9 = scalar_lea.hbm %s815_s7, 32  ;;  %p818_p10 = pneg %p1026_p9 }
  0x1f   : > { %p817_p2 = scmp.ne.s32.totalorder %s815_s7, %s816_s9  ;;  %s821_s22 = scalar_lea.hbm %s1112_s0, 64 }
  0x20   : > { %p822_p0 = scmp.lt.s32.totalorder %s815_s7, %s1112_s0  ;;  %p823_p3 = scmp.lt.s32.totalorder %s821_s22, %s816_s9 }
  0x21   : > { %p819_p12 = pnand %p818_p10, %p817_p2 }
  0x22   : > { %p824_p7 = por %p823_p3, %p822_p0 }
  0x23   : > { %p820_p13 = pneg %p819_p12 }
  0x25   : > { %p825_p11 = pnand %p824_p7, %p820_p13 }
  0x27   : > { %828 = shalt.err (!%p825_p11)
}
  0x28   : > { %703 = dma.hbm_to_vmem [thread:$0]  (!%p1026_p9), %s171_s4, 512, %s173_s28, %s161_s6, %s917_s29, %s917_s29, %s918_s30  }
  0x29   : > { %184 = sbr.rel (%p987_p8) target bundleno = 368 (0x170), region = 32  ;;  %s1046_s20 = sand.u32 (!%p987_p8), 1, %s906_s13  }
  0x2a   : > { %s647_s26 = sshll.u32 (!%p987_p8), %s1046_s20, 5  ;;  %s187_s27 = scalar_lea.sflag (!%p987_p8), [#allocation3], %s1046_s20 }
  0x2b   : > { %s1050_s7 = scalar_lea.vmem (!%p987_p8), [#allocation2], %s647_s26 }
  0x2e   : > { %889 = dma.done.wait (%p974_p4), %s187_s27, 512  }
  0x2f   : > { %891 = vsyncadd (%p974_p4), %s187_s27, 4294966784 }
  0x30   : > { %893 = dma.done.wait (%p41_p1), [#allocation6], 12288  }
  0x31   : > { %895 = vsyncadd (%p41_p1), [#allocation6], 4294955008  ;;  %v258_v0 = vld [vmem:[#allocation5 + $0xf0] sm:$0xff]  ;;  %v256_v1 = vld [vmem:[#allocation5 + $0xe0] sm:$0xff]  ;;  %vm276_vm0 = vcmask 523264   ;;  %vm383_vm1 = vcmask 1040384  }
  0x32   : > { %283 = vmatpush.msra.mxu0 %v258_v0  ;;  %v254_v2 = vld [vmem:[#allocation5 + $0xd0] sm:$0xff]  ;;  %v272_v4 = vld [vmem:[#allocation5 + $0x160] sm:$0xff]  ;;  %v259_v11 = vld [vmem:[#allocation5 + $0xf8] sm:$0xff]  ;;  %vm390_vm5 = vcmask 1046528   ;;  %s650_s18 = sshll.u32 %s1046_s20, 4  ;;  %s664_s23 = sshll.u32 %s965_s16, 4 }
  0x33   : > { %v274_v3 = vld [vmem:[#allocation5 + $0x170] sm:$0xff]  ;;  %v252_v5 = vld [vmem:[#allocation5 + $0xc0] sm:$0xff]  ;;  %v257_v12 = vld [vmem:[#allocation5 + $0xe8] sm:$0xff]  ;;  %329 = vmatpush.msra.mxu2 %v259_v11  ;;  %s542_s28 = scalar_lea.hbm %s1115_s3, %s664_s23  ;;  %s223_s4 = scalar_lea.vmem [#allocation8], %s650_s18 }
  0x34   : > { %284 = vmatpush.msra.mxu0 %v256_v1  ;;  %314 = vmatpush.msra.mxu1 %v274_v3  ;;  %v270_v6 = vld [vmem:[#allocation5 + $0x150] sm:$0xff]  ;;  %v268_v8 = vld [vmem:[#allocation5 + $0x140] sm:$0xff]  ;;  %v275_v14 = vld [vmem:[#allocation5 + $0x178] sm:$0xff]  ;;  %s543_s5 = sshll.u32 %s223_s4, 4  ;;  %s545_s16 = sshll.u32 %s542_s28, 4  ;;  %s544_s5 = int_to_ptr.vmem [resolvable:$true] %s543_s5  ;;  %s546_s16 = int_to_ptr.hbm [resolvable:$true] %s545_s16 }
  0x35   : > { %v250_v7 = vld [vmem:[#allocation5 + $0xb0] sm:$0xff]  ;;  %v248_v9 = vld [vmem:[#allocation5 + $0xa0] sm:$0xff]  ;;  %v255_v16 = vld [vmem:[#allocation5 + $0xd8] sm:$0xff]  ;;  %360 = vmatpush.msra.mxu3 %v275_v14  ;;  %330 = vmatpush.msra.mxu2 %v257_v12  ;;  %s531_s6 = scalar_lea.sflag [#allocation4], %s1046_s20  ;;  %s858_s9 = sshra.s32 %s546_s16, 4  ;;  %s859_s9 = int_to_ptr.hbm [resolvable:$true] %s858_s9 }
  0x36   : > { %285 = vmatpush.msra.mxu0 %v254_v2  ;;  %315 = vmatpush.msra.mxu1 %v272_v4  ;;  %v266_v10 = vld [vmem:[#allocation5 + $0x130] sm:$0xff]  ;;  %v264_v15 = vld [vmem:[#allocation5 + $0x120] sm:$0xff]  ;;  %v273_v17 = vld [vmem:[#allocation5 + $0x168] sm:$0xff]  ;;  %s860_s10 = scalar_lea.hbm %s859_s9, 16  ;;  %s864_s24 = scalar_lea.hbm %s1115_s3, 32 }
  0x37   : > { %v246_v13 = vld [vmem:[#allocation5 + $0x90] sm:$0xff]  ;;  %v244_v18 = vld [vmem:[#allocation5 + $0x80] sm:$0xff]  ;;  %v271_v19 = vld [vmem:[#allocation5 + $0x158] sm:$0xff]  ;;  %361 = vmatpush.msra.mxu3 %v273_v17  ;;  %331 = vmatpush.msra.mxu2 %v255_v16  ;;  %p861_p1 = scmp.ne.s32.totalorder %s859_s9, %s860_s10  ;;  %p865_p11 = scmp.lt.s32.totalorder %s859_s9, %s1115_s3 }
  0x38   : > { %286 = vmatpush.msra.mxu0 %v252_v5  ;;  %316 = vmatpush.msra.mxu1 %v270_v6  ;;  %v262_v20 = vld [vmem:[#allocation5 + $0x110] sm:$0xff]  ;;  %v253_v21 = vld [vmem:[#allocation5 + $0xc8] sm:$0xff]  ;;  %v260_v24 = vld [vmem:[#allocation5 + $0x100] sm:$0xff]  ;;  %p866_p9 = scmp.lt.s32.totalorder %s864_s24, %s860_s10 }
  0x39   : > { %v242_v22 = vld [vmem:[#allocation5 + $0x70] sm:$0xff]  ;;  %v269_v23 = vld [vmem:[#allocation5 + $0x148] sm:$0xff]  ;;  %v251_v25 = vld [vmem:[#allocation5 + $0xb8] sm:$0xff]  ;;  %362 = vmatpush.msra.mxu3 %v271_v19  ;;  %332 = vmatpush.msra.mxu2 %v253_v21  ;;  %p862_p4 = pnand %p861_p1, %p1016_p5 }
  0x3a   : > { %287 = vmatpush.msra.mxu0 %v250_v7  ;;  %317 = vmatpush.msra.mxu1 %v268_v8  ;;  %v240_v26 = vld [vmem:[#allocation5 + $0x60] sm:$0xff]  ;;  %v1061_v27 = vld [vmem:[%s1050_s7 + $0x8] sm:$0xff]  ;;  %v267_v29 = vld [vmem:[#allocation5 + $0x138] sm:$0xff]  ;;  %p867_p2 = por %p866_p9, %p865_p11 }
  0x3b   : > { %v249_v28 = vld [vmem:[#allocation5 + $0xa8] sm:$0xff]  ;;  %363 = vmatpush.msra.mxu3 %v269_v23  ;;  %v238_v30 = vld [vmem:[#allocation5 + $0x50] sm:$0xff]  ;;  %333 = vmatpush.msra.mxu2 %v251_v25  ;;  %v412_v31 = vld [vmem:[#allocation7 + $0x78] sm:$0xff]  ;;  %p863_p8 = pneg %p862_p4 }
  0x3c   : > { %288 = vmatpush.msra.mxu0 %v248_v9  ;;  %318 = vmatpush.msra.mxu1 %v266_v10  ;;  %v247_v32 = vld [vmem:[#allocation5 + $0x98] sm:$0xff]  ;;  %v265_v33 = vld [vmem:[#allocation5 + $0x128] sm:$0xff]  ;;  %v236_v34 = vld [vmem:[#allocation5 + $0x40] sm:$0xff] }
  0x3d   : > { %334 = vmatpush.msra.mxu2 %v249_v28  ;;  %364 = vmatpush.msra.mxu3 %v267_v29  ;;  %v411_v35 = vld [vmem:[#allocation7 + $0x70] sm:$0xff]  ;;  %v245_v36 = vld [vmem:[#allocation5 + $0x88] sm:$0xff]  ;;  %v263_v37 = vld [vmem:[#allocation5 + $0x118] sm:$0xff]  ;;  %p868_p10 = pnand %p867_p2, %p863_p8 }
  0x3e   : > { %289 = vmatpush.msra.mxu0 %v246_v13  ;;  %319 = vmatpush.msra.mxu1 %v264_v15  ;;  %v234_v38 = vld [vmem:[#allocation5 + $0x30] sm:$0xff]  ;;  %v410_v39 = vld [vmem:[#allocation7 + $0x68] sm:$0xff]  ;;  %v243_v40 = vld [vmem:[#allocation5 + $0x78] sm:$0xff] }
  0x3f   : > { %335 = vmatpush.msra.mxu2 %v247_v32  ;;  %365 = vmatpush.msra.mxu3 %v265_v33  ;;  %v261_v41 = vld [vmem:[#allocation5 + $0x108] sm:$0xff]  ;;  %v232_v42 = vld [vmem:[#allocation5 + $0x20] sm:$0xff]  ;;  %v1066_v43 = vld [vmem:[%s1050_s7 + $0x18] sm:$0xff] }
  0x40   : > { %290 = vmatpush.msra.mxu0 %v244_v18  ;;  %320 = vmatpush.msra.mxu1 %v262_v20  ;;  %v241_v44 = vld [vmem:[#allocation5 + $0x68] sm:$0xff]  ;;  %v428_v45 = vld [vmem:[#allocation7 + $0xf8] sm:$0xff]  ;;  %v230_v46 = vld [vmem:[#allocation5 + $0x10] sm:$0xff] }
  0x41   : > { %336 = vmatpush.msra.mxu2 %v245_v36  ;;  %366 = vmatpush.msra.mxu3 %v263_v37  ;;  %v409_v47 = vld [vmem:[#allocation7 + $0x60] sm:$0xff]  ;;  %v239_v48 = vld [vmem:[#allocation5 + $0x58] sm:$0xff]  ;;  %v427_v49 = vld [vmem:[#allocation7 + $0xf0] sm:$0xff] }
  0x42   : > { %291 = vmatpush.msra.mxu0 %v242_v22  ;;  %321 = vmatpush.msra.mxu1 %v260_v24  ;;  %v228_v50 = vld [vmem:[#allocation5] sm:$0xff]  ;;  %v408_v51 = vld [vmem:[#allocation7 + $0x58] sm:$0xff]  ;;  %v237_v53 = vld [vmem:[#allocation5 + $0x48] sm:$0xff] }
  0x43   : > { %651 = vmatmul.msk.f32.vlgmr.msra.gmra.mxu1 %vm276_vm0, %v1061_v27  ;;  %337 = vmatpush.msra.mxu2 %v243_v40  ;;  %v224_v52 = vld [vmem:[%s1050_s7] sm:$0xff]  ;;  %v426_v54 = vld [vmem:[#allocation7 + $0xe8] sm:$0xff]  ;;  %v444_v55 = vld [vmem:[#allocation7 + $0x178] sm:$0xff] }
  0x44   : > { %292 = vmatpush.msra.mxu0 %v240_v26  ;;  %445 = vmatpush.msrb.mxu1 %v412_v31  ;;  %v235_v56 = vld [vmem:[#allocation5 + $0x38] sm:$0xff]  ;;  %v407_v57 = vld [vmem:[#allocation7 + $0x50] sm:$0xff]  ;;  %v425_v58 = vld [vmem:[#allocation7 + $0xe0] sm:$0xff] }
  0x45   : > { %367 = vmatpush.msra.mxu3 %v261_v41  ;;  %338 = vmatpush.msra.mxu2 %v241_v44  ;;  %v443_v59 = vld [vmem:[#allocation7 + $0x170] sm:$0xff]  ;;  %v233_v60 = vld [vmem:[#allocation5 + $0x28] sm:$0xff]  ;;  %v424_v62 = vld [vmem:[#allocation7 + $0xd8] sm:$0xff] }
  0x46   : > { %293 = vmatpush.msra.mxu0 %v238_v30  ;;  %446 = vmatpush.msrb.mxu1 %v411_v35  ;;  %v406_v61 = vld [vmem:[#allocation7 + $0x48] sm:$0xff]  ;;  %v231_v0 = vld [vmem:[#allocation5 + $0x18] sm:$0xff]  ;;  %v423_v1 = vld [vmem:[#allocation7 + $0xd0] sm:$0xff] }
  0x47   : > { %468 = vmatpush.msrb.mxu3 %v428_v45  ;;  %339 = vmatpush.msra.mxu2 %v239_v48  ;;  %v442_v63 = vld [vmem:[#allocation7 + $0x168] sm:$0xff]  ;;  %v405_v2 = vld [vmem:[#allocation7 + $0x40] sm:$0xff]  ;;  %v226_v3 = vld [vmem:[%s1050_s7 + $0x10] sm:$0xff] }
  0x48   : > { %294 = vmatpush.msra.mxu0 %v236_v34  ;;  %447 = vmatpush.msrb.mxu1 %v410_v39  ;;  %v229_v4 = vld [vmem:[#allocation5 + $0x8] sm:$0xff]  ;;  %v441_v6 = vld [vmem:[#allocation7 + $0x160] sm:$0xff]  ;;  %v404_v8 = vld [vmem:[#allocation7 + $0x38] sm:$0xff] }
  0x49   : > { %469 = vmatpush.msrb.mxu3 %v427_v49  ;;  %340 = vmatpush.msra.mxu2 %v237_v53  ;;  %v422_v5 = vld [vmem:[#allocation7 + $0xc8] sm:$0xff]  ;;  %v421_v7 = vld [vmem:[#allocation7 + $0xc0] sm:$0xff]  ;;  %v440_v9 = vld [vmem:[#allocation7 + $0x158] sm:$0xff] }
  0x4a   : > { %295 = vmatpush.msra.mxu0 %v234_v38  ;;  %448 = vmatpush.msrb.mxu1 %v409_v47  ;;  %v420_v10 = vld [vmem:[#allocation7 + $0xb8] sm:$0xff]  ;;  %v403_v11 = vld [vmem:[#allocation7 + $0x30] sm:$0xff]  ;;  %v402_v14 = vld [vmem:[#allocation7 + $0x28] sm:$0xff] }
  0x4b   : > { %652 = vmatmul.msk.f32.gmra.mxu1 %vm276_vm0, %v1066_v43  ;;  %470 = vmatpush.msrb.mxu3 %v426_v54  ;;  %v439_v12 = vld [vmem:[#allocation7 + $0x150] sm:$0xff]  ;;  %v418_v15 = vld [vmem:[#allocation7 + $0xa8] sm:$0xff]  ;;  %v417_v17 = vld [vmem:[#allocation7 + $0xa0] sm:$0xff] }
  0x4c   : > { %296 = vmatpush.msra.mxu0 %v232_v42  ;;  %449 = vmatpush.msrb.mxu1 %v408_v51  ;;  %v419_v13 = vld [vmem:[#allocation7 + $0xb0] sm:$0xff]  ;;  %v438_v16 = vld [vmem:[#allocation7 + $0x148] sm:$0xff]  ;;  %v401_v18 = vld [vmem:[#allocation7 + $0x20] sm:$0xff] }
  0x4d   : > { %341 = vmatpush.msra.mxu2 %v235_v56  ;;  %471 = vmatpush.msrb.mxu3 %v425_v58  ;;  %v437_v19 = vld [vmem:[#allocation7 + $0x140] sm:$0xff]  ;;  %v416_v20 = vld [vmem:[#allocation7 + $0x98] sm:$0xff]  ;;  %v415_v22 = vld [vmem:[#allocation7 + $0x90] sm:$0xff] }
  0x4e   : > { %297 = vmatpush.msra.mxu0 %v230_v46  ;;  %450 = vmatpush.msrb.mxu1 %v407_v57  ;;  %v400_v21 = vld [vmem:[#allocation7 + $0x18] sm:$0xff]  ;;  %v399_v24 = vld [vmem:[#allocation7 + $0x10] sm:$0xff]  ;;  %v414_v25 = vld [vmem:[#allocation7 + $0x88] sm:$0xff] }
  0x4f   : > { %342 = vmatpush.msra.mxu2 %v233_v60  ;;  %472 = vmatpush.msrb.mxu3 %v424_v62  ;;  %v436_v23 = vld [vmem:[#allocation7 + $0x138] sm:$0xff]  ;;  %v435_v26 = vld [vmem:[#allocation7 + $0x130] sm:$0xff]  ;;  %v413_v28 = vld [vmem:[#allocation7 + $0x80] sm:$0xff] }
  0x50   : > { %298 = vmatpush.msra.mxu0 %v228_v50  ;;  %451 = vmatpush.msrb.mxu1 %v406_v61  ;;  %v434_v29 = vld [vmem:[#allocation7 + $0x128] sm:$0xff]  ;;  %v397_v30 = vld [vmem:[#allocation7] sm:$0xff]  ;;  %v432_v32 = vld [vmem:[#allocation7 + $0x118] sm:$0xff] }
  0x51   : > { %299 = vmatmul.f32.vlgmr.msra.gmra.mxu0 %v224_v52  ;;  %343 = vmatpush.msra.mxu2 %v231_v0  ;;  %v433_v31 = vld [vmem:[#allocation7 + $0x120] sm:$0xff]  ;;  %v431_v33 = vld [vmem:[#allocation7 + $0x110] sm:$0xff]  ;;  %v430_v34 = vld [vmem:[#allocation7 + $0x108] sm:$0xff] }
  0x52   : > { %491 = vmatpush.msrb.mxu0 %v444_v55  ;;  %653 = vmatmul.msk.f32.vlgmr.msra.gmra.mxu3 %vm276_vm0, %v1061_v27  ;;  %v398_v27 = vld [vmem:[#allocation7 + $0x8] sm:$0xff]  ;;  %v429_v35 = vld [vmem:[#allocation7 + $0x100] sm:$0xff]  ;;  %vm655_vm3 = vmneg %vm383_vm1 }
  0x53   : > { %473 = vmatpush.msrb.mxu3 %v423_v1  ;;  %452 = vmatpush.msrb.mxu1 %v405_v2 }
  0x54   : > { %492 = vmatpush.msrb.mxu0 %v443_v59  ;;  %344 = vmatpush.msra.mxu2 %v229_v4 }
  0x55   : > { %474 = vmatpush.msrb.mxu3 %v422_v5  ;;  %345 = vmatmul.f32.vlgmr.msra.gmra.mxu2 %v224_v52 }
  0x56   : > { %493 = vmatpush.msrb.mxu0 %v442_v63  ;;  %665 = vmatpush.msrb.mxu2 %v444_v55 }
  0x57   : > { %475 = vmatpush.msrb.mxu3 %v421_v7  ;;  %453 = vmatpush.msrb.mxu1 %v404_v8 }
  0x58   : > { %494 = vmatpush.msrb.mxu0 %v441_v6  ;;  %666 = vmatpush.msrb.mxu2 %v443_v59 }
  0x59   : > { %302 = vmatmul.f32.gmra.mxu0 %v226_v3  ;;  %476 = vmatpush.msrb.mxu3 %v420_v10 }
  0x5a   : > { %495 = vmatpush.msrb.mxu0 %v440_v9  ;;  %667 = vmatpush.msrb.mxu2 %v442_v63 }
  0x5b   : > { %454 = vmatpush.msrb.mxu1 %v403_v11  ;;  %477 = vmatpush.msrb.mxu3 %v419_v13 }
  0x5c   : > { %496 = vmatpush.msrb.mxu0 %v439_v12  ;;  %668 = vmatpush.msrb.mxu2 %v441_v6 }
  0x5d   : > { %455 = vmatpush.msrb.mxu1 %v402_v14  ;;  %654 = vmatmul.msk.f32.gmra.mxu3 %vm276_vm0, %v1066_v43 }
  0x5e   : > { %669 = vmatpush.msrb.mxu2 %v440_v9  ;;  %478 = vmatpush.msrb.mxu3 %v418_v15 }
  0x5f   : > { %348 = vmatmul.f32.gmra.mxu2 %v226_v3  ;;  %497 = vmatpush.msrb.mxu0 %v438_v16 }
  0x60   : > { %670 = vmatpush.msrb.mxu2 %v439_v12  ;;  %479 = vmatpush.msrb.mxu3 %v417_v17 }
  0x61   : > { %456 = vmatpush.msrb.mxu1 %v401_v18  ;;  %498 = vmatpush.msrb.mxu0 %v437_v19 }
  0x62   : > { %671 = vmatpush.msrb.mxu2 %v438_v16  ;;  %480 = vmatpush.msrb.mxu3 %v416_v20 }
  0x63   : > { %457 = vmatpush.msrb.mxu1 %v400_v21  ;;  %499 = vmatpush.msrb.mxu0 %v436_v23 }
  0x64   : > { %672 = vmatpush.msrb.mxu2 %v437_v19  ;;  %481 = vmatpush.msrb.mxu3 %v415_v22 }
  0x65   : > { %458 = vmatpush.msrb.mxu1 %v399_v24  ;;  %500 = vmatpush.msrb.mxu0 %v435_v26 }
  0x66   : > { %673 = vmatpush.msrb.mxu2 %v436_v23  ;;  %482 = vmatpush.msrb.mxu3 %v414_v25 }
  0x67   : > { %459 = vmatpush.msrb.mxu1 %v398_v27  ;;  %501 = vmatpush.msrb.mxu0 %v434_v29 }
  0x68   : > { %674 = vmatpush.msrb.mxu2 %v435_v26  ;;  %483 = vmatpush.msrb.mxu3 %v413_v28 }
  0x69   : > { %460 = vmatpush.msrb.mxu1 %v397_v30  ;;  %502 = vmatpush.msrb.mxu0 %v433_v31 }
  0x6a   : > { %675 = vmatpush.msrb.mxu2 %v434_v29 }
  0x6b   : > { %503 = vmatpush.msrb.mxu0 %v432_v32 }
  0x6c   : > { %676 = vmatpush.msrb.mxu2 %v433_v31 }
  0x6d   : > { %504 = vmatpush.msrb.mxu0 %v431_v33 }
  0x6e   : > { %677 = vmatpush.msrb.mxu2 %v432_v32 }
  0x6f   : > { %505 = vmatpush.msrb.mxu0 %v430_v34 }
  0x70   : > { %678 = vmatpush.msrb.mxu2 %v431_v33 }
  0x71   : > { %506 = vmatpush.msrb.mxu0 %v429_v35 }
  0x72   : > { %679 = vmatpush.msrb.mxu2 %v430_v34 }
  0x74   : > { %680 = vmatpush.msrb.mxu2 %v429_v35 }
  0xc0   : > { %v323_v36 = vpop.f32.mrf.mxu1 }
  0xc8   : > { %v326_v42 = vpop.f32.mrf.mxu1 }
  0xce   : > { %v300_v37 = vpop.f32.mrf.mxu0 }
  0xcf   : > { %v324_v38 = vadd.f32 %v323_v36, %v300_v37 }
  0xd1   : > { %v377_v39 = vmul.f32 0.1, %v324_v38  ;;  %vm375_vm2 = vcmp.gt.f32.partialorder %v324_v38, 0.0 }
  0xd3   : > { %v379_v40 = vsel %vm375_vm2, %v324_v38, %v377_v39 }
  0xd4   : > { %v384_v41 = vrot.slane %v379_v40, 7  ;;  %484 = vmatmul.f32.vlgmr.msrb.gmra.mxu3 %v379_v40  ;;  %v391_v47 = vrot.slane %v379_v40, 1 }
  0xd5   : > { %v369_v52 = vpop.f32.mrf.mxu3 }
  0xd6   : > { %v303_v43 = vpop.f32.mrf.mxu0  ;;  %656 = vmatmul.msk.f32.vlgmr.msrb.gmra.mxu1 %vm655_vm3, %v384_v41 }
  0xd7   : > { %v327_v44 = vadd.f32 %v326_v42, %v303_v43 }
  0xd8   : > { %v346_v54 = vpop.f32.mrf.mxu2 }
  0xd9   : > { %v378_v45 = vmul.f32 0.1, %v327_v44  ;;  %vm376_vm4 = vcmp.gt.f32.partialorder %v327_v44, 0.0  ;;  %v370_v0 = vadd.f32 %v369_v52, %v346_v54 }
  0xdb   : > { %v380_v46 = vsel %vm376_vm4, %v327_v44, %v378_v45 }
  0xdc   : > { %v385_v48 = vrot.slane %v380_v46, 7  ;;  %v392_v49 = vrot.slane %v380_v46, 1  ;;  %487 = vmatmul.f32.gmra.mxu3 %v380_v46 }
  0xde   : > { %657 = vmatmul.msk.f32.vlgmr.msrb.gmra.mxu2 %vm390_vm5, %v392_v49  ;;  %v386_v50 = vsel %vm383_vm1, %v384_v41, %v385_v48  ;;  %v393_v51 = vsel %vm390_vm5, %v391_v47, %v392_v49 }
  0xdf   : > { %464 = vmatmul.f32.gmra.mxu1 %v386_v50  ;;  %507 = vmatmul.f32.vlgmr.msrb.gmra.mxu0 %v393_v51 }
  0xe0   : > { %v372_v53 = vpop.f32.mrf.mxu3 }
  0xe2   : > { %v349_v57 = vpop.f32.mrf.mxu2 }
  0xe3   : > { %v373_v8 = vadd.f32 %v372_v53, %v349_v57 }
 0x153   : > { %v462_v55 = vpop.f32.mrf.mxu1 }
 0x157   : > { %v485_v56 = vpop.f32.mrf.mxu3 }
 0x158   : > { %v486_v58 = vadd.f32 %v485_v56, %v462_v55 }
 0x15c   : > { %v508_v59 = vpop.f32.mrf.mxu0  ;;  %v465_v61 = vpop.f32.mrf.mxu1 }
 0x15d   : > { %v509_v60 = vadd.f32 %v508_v59, %v486_v58 }
 0x15f   : > { %vm514_vm6 = vcmp.gt.f32.partialorder %v509_v60, 0.0  ;;  %v516_v62 = vmul.f32 0.1, %v509_v60  ;;  %v488_v63 = vpop.f32.mrf.mxu3 }
 0x160   : > { %v489_v1 = vadd.f32 %v488_v63, %v465_v61 }
 0x161   : > { %v518_v2 = vsel %vm514_vm6, %v509_v60, %v516_v62  ;;  %v511_v3 = vpop.f32.mrf.mxu2 }
 0x162   : > { %v520_v4 = vadd.f32 %v518_v2, %v370_v0  ;;  %v512_v5 = vadd.f32 %v511_v3, %v489_v1 }
 0x164   : > { %vm522_vm7 = vcmp.gt.f32.partialorder %v520_v4, 0.0  ;;  %v524_v6 = vmul.f32 0.1, %v520_v4  ;;  %vm515_vm8 = vcmp.gt.f32.partialorder %v512_v5, 0.0  ;;  %v517_v7 = vmul.f32 0.1, %v512_v5 }
 0x166   : > { %v526_v9 = vsel %vm522_vm7, %v520_v4, %v524_v6  ;;  %v519_v10 = vsel %vm515_vm8, %v512_v5, %v517_v7 }
 0x167   : > { %528 = vst [vmem:[%s223_s4] sm:$0xff] %v526_v9  ;;  %v521_v11 = vadd.f32 %v519_v10, %v373_v8 }
 0x169   : > { %vm523_vm9 = vcmp.gt.f32.partialorder %v521_v11, 0.0  ;;  %v525_v12 = vmul.f32 0.1, %v521_v11 }
 0x16b   : > { %v527_v13 = vsel %vm523_vm9, %v521_v11, %v525_v12 }
 0x16c   : > { %529 = vst [vmem:[%s223_s4 + $0x8] sm:$0xff] %v527_v13 }
 0x16d   : > { %871 = shalt.err (!%p868_p10)
}
 0x16e   : > { %s922_s20 = smov 128   ;;  %s923_s27 = smov 8  }
 0x16f   : > { %691 = dma.vmem_to_hbm [thread:$0]  (%p1016_p5), %s544_s5, 256, %s546_s16, %s531_s6, %s922_s20, %s922_s20, %s923_s27  }
 0x170 PF: > { %s560_s7 = sand.u32 1, %s902_s12   ;;  %p1121_p12 = scmp.ge.s32.totalorder %s914_s15, 2 }
 0x171   : > { %s561_s18 = scalar_lea.sflag [#allocation4], %s560_s7 }
 0x172   : > { %p705_p13 = pnand %p1121_p12, %p979_p6 }
 0x174   : > { %p706_p0 = pneg %p705_p13 }
 0x176   : > { %897 = dma.done.wait (%p706_p0), %s561_s18, 256  }
 0x177   : > { %899 = vsyncadd (%p706_p0), %s561_s18, 4294967040  ;;  %p17_p3 = scmp.ge.s32.totalorder %s1003_s8, 4   ;;  %s1122_s12 = smov %s906_s13 }
 0x178   : > { %s1123_s13 = smov %s910_s14  ;;  %s1124_s14 = smov %s1012_s11 }
 0x179   : > { %s1125_s15 = smov %s1003_s8  ;;  %19 = sbr.rel (!%p17_p3) target bundleno = 6 (0x6), region = 85 }
 0x17e   :  { %567 = vsyncpa [#allocation3], 1 }
 0x17f   :  { %569 = vsyncpa [#allocation3 + $0x1], 1 }
 0x180   :  { %570 = vsyncpa [#allocation6], 1 }
 0x181   :  { %571 = vsyncpa [#allocation4], 1 }
 0x182   :  { %573 = vsyncpa [#allocation4 + $0x1], 1 }

</bundles_post_ra>
